<compile_context>
chip_gen: v7x
topology: tpu7x:2x2x1
jax: 0.10.0
libtpu: 0.0.40
codegen_flags: <defaults>
</compile_context>

<pallas_src>
import jax
import jax.numpy as jnp
from jax import lax
from jax.experimental import pallas as pl
from jax.experimental.pallas import tpu as pltpu


# --------------------------------------------------------------------------
# Fused kernel (one batch chunk per grid step)
# --------------------------------------------------------------------------
def _make_block_kernel(stride, has_shortcut, mxu_dtype):
    s = int(stride)

    def kernel(x_ref, s1_ref, b1_ref, w1_ref, s2_ref, b2_ref, w2_ref, y_ref):
        chunk = x_ref.shape[0]
        Ho = x_ref.shape[2]
        L1 = x_ref.shape[3]                  # Wo * Cin
        L2 = y_ref.shape[2]                  # Wo * planes
        M = chunk * Ho

        def row_shift(a, uy):
            """out[:, yo, :] = a[:, yo + uy, :], zero at the H boundary
            (this is the conv's zero padding along H)."""
            assert uy in (-1, 0, 1)
            if uy == 0:
                return a
            z = jnp.zeros((chunk, 1, a.shape[-1]), a.dtype)
            if uy < 0:
                return jnp.concatenate([z, a[:, :Ho - 1, :]], axis=1)
            return jnp.concatenate([a[:, 1:, :], z], axis=1)

        # ---- stage 1: relu(bn1(x)) per spatial-parity plane.  Minor dim
        # packs (W, Cin) -> lane-dense VPU work; f32 math, one cast per plane
        # to the MXU operand dtype. -------------------------------------------
        xb = x_ref[...]                      # (chunk, s*s, Ho, L1)
        s1 = s1_ref[...]                     # (1, L1)
        b1 = b1_ref[...]
        acts = []
        for k in range(s * s):
            a = jnp.maximum(xb[:, k, :, :] * s1 + b1, 0.0)
            acts.append(a.astype(mxu_dtype))

        # ---- conv1 (3x3, stride s) as ONE matmul: 3*s row-shifted parity
        # slabs concatenated along K against a banded weight (wrapper-built).
        slabs1 = []
        for ky in range(3):
            py = (ky - 1) % s
            uy = (ky - 1 - py) // s          # row offset inside a parity plane
            for px in range(s):
                slabs1.append(row_shift(acts[py * s + px], uy))
        patches1 = jnp.concatenate(slabs1, axis=-1).reshape(M, 3 * s * L1)
        h = jnp.dot(patches1, w1_ref[...],
                    preferred_element_type=jnp.float32)        # (M, L2) f32

        # ---- stage 2: relu(bn2(h)); conv2 (3x3, stride 1) as ONE matmul.
        # The projection shortcut is folded into the conv2 band weight as an
        # extra K block fed by the (0,0) parity plane of relu(bn1(x)). -------
        act2 = jnp.maximum(h * s2_ref[...] + b2_ref[...], 0.0)
        act2 = act2.astype(mxu_dtype).reshape(chunk, Ho, L2)
        slabs2 = [row_shift(act2, ky - 1) for ky in range(3)]
        if has_shortcut:
            slabs2.append(acts[0])           # relu(bn1(x))[:, ::s, ::s, :]
        k2 = 3 * L2 + (L1 if has_shortcut else 0)
        patches2 = jnp.concatenate(slabs2, axis=-1).reshape(M, k2)
        y = jnp.dot(patches2, w2_ref[...],
                    preferred_element_type=jnp.float32)        # (M, L2) f32

        if not has_shortcut:
            # Identity shortcut (stride 1, Cin == planes): exact f32 add of x.
            y = y + xb[:, 0, :, :].reshape(M, L2)

        # Lane-dense store: minor dim is Wo*planes (64..128 here), not P=8.
        y_ref[...] = y.reshape(chunk, Ho, L2).astype(y_ref.dtype)

    return kernel


# --------------------------------------------------------------------------
# Banded matmul weights (wrapper-side, plain JAX)
# --------------------------------------------------------------------------
def _band_weights_3x3(w_oihw, stride, Wo):
    """Banded weight for a 3x3 'same' conv at `stride` acting on the
    row-shifted, (W, C)-flattened slabs.  K blocks are ordered as
    [(ky, px) for ky in range(3) for px in range(stride)] to match the slab
    order built inside the kernel.  Shape: (3*stride*Wo*Cin, Wo*Cout)."""
    Cout, Cin = w_oihw.shape[0], w_oihw.shape[1]
    w_t = jnp.transpose(w_oihw, (2, 3, 1, 0)).astype(jnp.float32)  # (ky,kx,ci,o)
    xi = jnp.arange(Wo)[:, None]
    xo = jnp.arange(Wo)[None, :]
    blocks = []
    for ky in range(3):
        for px in range(stride):
            kx = stride * (xi - xo) + (px + 1)       # tap index per (xi, xo)
            valid = (kx >= 0) & (kx <= 2)            # W zero-padding == band clip
            kxc = jnp.clip(kx, 0, 2)
            blk = w_t[ky][kxc]                       # (Wo, Wo, Cin, Cout)
            blk = jnp.where(valid[:, :, None, None], blk, 0.0)
            blocks.append(
                jnp.transpose(blk, (0, 2, 1, 3)).reshape(Wo * Cin, Wo * Cout))
    return jnp.concatenate(blocks, axis=0)


# --------------------------------------------------------------------------
# Wrapper
# --------------------------------------------------------------------------
def preact_block_forward(x_nchw, params, *, stride, mxu_dtype=jnp.bfloat16,
                         batch_chunk=None):
    """PreActBlock forward: (B, Cin, H, W) f32 -> (B, planes, H//s, W//s) f32.

    mxu_dtype: MXU operand dtype (bf16 default = native MXU path on
    v5e/v6e/v7x; f32 accumulation is kept either way).
    batch_chunk: images per grid step.  Default splits the batch in two so a
    "parallel" grid can shard across v7x's two TensorCores; pass batch_chunk=B
    for a single whole-batch step on single-TC v5e/v6e.
    """
    eps = 1e-5
    s = int(stride)
    x = jnp.transpose(x_nchw, (0, 2, 3, 1)).astype(jnp.float32)   # NCHW -> NHWC
    B, H, W, Cin = x.shape
    assert H % s == 0 and W % s == 0, "spatial dims must be divisible by stride"
    Ho, Wo = H // s, W // s

    P = params["conv1_w"].shape[0]
    has_shortcut = (s != 1) or (Cin != P)

    if batch_chunk is None:
        batch_chunk = B // 2 if (B >= 2 and B % 2 == 0) else B
    assert B % batch_chunk == 0
    grid = (B // batch_chunk,)

    # Fold BatchNorm (inference / running stats) into scale+shift, tiled
    # across W so the in-kernel elementwise stage is lane-dense.
    s1v = params["bn1_gamma"] * lax.rsqrt(params["bn1_var"] + eps)
    b1v = params["bn1_beta"] - params["bn1_mean"] * s1v
    s2v = params["bn2_gamma"] * lax.rsqrt(params["bn2_var"] + eps)
    b2v = params["bn2_beta"] - params["bn2_mean"] * s2v
    s1_t = jnp.tile(s1v, Wo).reshape(1, Wo * Cin)
    b1_t = jnp.tile(b1v, Wo).reshape(1, Wo * Cin)
    s2_t = jnp.tile(s2v, Wo).reshape(1, Wo * P)
    b2_t = jnp.tile(b2v, Wo).reshape(1, Wo * P)

    # Banded matmul weights (built once).  The projection shortcut is folded
    # into the conv2 band as an extra K block (kron(I_W, ws)).
    w1_band = _band_weights_3x3(params["conv1_w"], s, Wo)        # (3*s*Wo*Cin, Wo*P)
    w2_band = _band_weights_3x3(params["conv2_w"], 1, Wo)        # (3*Wo*P, Wo*P)
    if has_shortcut:
        ws_t = jnp.transpose(params["shortcut_w"].reshape(P, Cin), (1, 0))
        w2_band = jnp.concatenate(
            [w2_band, jnp.kron(jnp.eye(Wo, dtype=jnp.float32), ws_t)], axis=0)
    w1_band = w1_band.astype(mxu_dtype)
    w2_band = w2_band.astype(mxu_dtype)

    # Space-to-depth (pixel-unshuffle): the conv stride becomes s*s spatial
    # parity planes so the kernel only does unit-stride row shifts; last dim
    # is the lane-dense (Wo, Cin) flattening.
    x_p = x.reshape(B, Ho, s, Wo, s, Cin).transpose(0, 2, 4, 1, 3, 5)
    x_p = x_p.reshape(B, s * s, Ho, Wo * Cin)

    inputs = [x_p, s1_t, b1_t, w1_band, s2_t, b2_t, w2_band]
    in_specs = [
        pl.BlockSpec((batch_chunk, s * s, Ho, Wo * Cin), lambda b: (b, 0, 0, 0)),
        pl.BlockSpec((1, Wo * Cin), lambda b: (0, 0)),
        pl.BlockSpec((1, Wo * Cin), lambda b: (0, 0)),
        pl.BlockSpec(w1_band.shape, lambda b: (0, 0)),
        pl.BlockSpec((1, Wo * P), lambda b: (0, 0)),
        pl.BlockSpec((1, Wo * P), lambda b: (0, 0)),
        pl.BlockSpec(w2_band.shape, lambda b: (0, 0)),
    ]

    y = pl.pallas_call(
        _make_block_kernel(s, has_shortcut, mxu_dtype),
        out_shape=jax.ShapeDtypeStruct((B, Ho, Wo * P), jnp.float32),
        grid=grid,
        in_specs=in_specs,
        out_specs=pl.BlockSpec((batch_chunk, Ho, Wo * P), lambda b: (b, 0, 0)),
        compiler_params=pltpu.CompilerParams(
            dimension_semantics=("parallel",)),
    )(*inputs)

    y = y.reshape(B, Ho, Wo, P)
    return jnp.transpose(y, (0, 3, 1, 2))                        # NHWC -> NCHW


# --------------------------------------------------------------------------
# Deterministic parameter init & pure-JAX reference
# --------------------------------------------------------------------------
def init_params(key, in_planes, planes, stride):
    ks = jax.random.split(key, 11)
    p = {
        "bn1_gamma": jax.random.uniform(ks[0], (in_planes,), jnp.float32, 0.5, 1.5),
        "bn1_beta": 0.1 * jax.random.normal(ks[1], (in_planes,), jnp.float32),
        "bn1_mean": 0.1 * jax.random.normal(ks[2], (in_planes,), jnp.float32),
        "bn1_var": jax.random.uniform(ks[3], (in_planes,), jnp.float32, 0.5, 1.5),
        "conv1_w": 0.2 * jax.random.normal(ks[4], (planes, in_planes, 3, 3), jnp.float32),
        "bn2_gamma": jax.random.uniform(ks[5], (planes,), jnp.float32, 0.5, 1.5),
        "bn2_beta": 0.1 * jax.random.normal(ks[6], (planes,), jnp.float32),
        "bn2_mean": 0.1 * jax.random.normal(ks[7], (planes,), jnp.float32),
        "bn2_var": jax.random.uniform(ks[8], (planes,), jnp.float32, 0.5, 1.5),
        "conv2_w": 0.2 * jax.random.normal(ks[9], (planes, planes, 3, 3), jnp.float32),
    }
    if stride != 1 or in_planes != planes:
        p["shortcut_w"] = 0.2 * jax.random.normal(
            ks[10], (planes, in_planes, 1, 1), jnp.float32)
    return p


def _reference(x, params, stride):
    """Pure-JAX NCHW reference of PreActBlock.forward (BN in eval mode)."""
    eps = 1e-5

    def bn(v, pre):
        g = params[pre + "_gamma"][None, :, None, None]
        b = params[pre + "_beta"][None, :, None, None]
        m = params[pre + "_mean"][None, :, None, None]
        var = params[pre + "_var"][None, :, None, None]
        return (v - m) / jnp.sqrt(var + eps) * g + b

    dn = ("NCHW", "OIHW", "NCHW")
    hi = lax.Precision.HIGHEST
    out = jax.nn.relu(bn(x, "bn1"))
    if "shortcut_w" in params:
        shortcut = lax.conv_general_dilated(out, params["shortcut_w"],
                                            (stride, stride), ((0, 0), (0, 0)),
                                            dimension_numbers=dn, precision=hi)
    else:
        shortcut = x
    h = lax.conv_general_dilated(out, params["conv1_w"], (stride, stride),
                                 ((1, 1), (1, 1)), dimension_numbers=dn,
                                 precision=hi)
    h = jax.nn.relu(bn(h, "bn2"))
    h = lax.conv_general_dilated(h, params["conv2_w"], (1, 1),
                                 ((1, 1), (1, 1)), dimension_numbers=dn,
                                 precision=hi)
    return h + shortcut


# --------------------------------------------------------------------------
# Main
# --------------------------------------------------------------------------
if __name__ == "__main__":
    key = jax.random.PRNGKey(0)
    configs = [
        dict(B=2, in_planes=4, planes=8, H=16, W=16, stride=2),  # projection shortcut
        dict(B=2, in_planes=8, planes=8, H=16, W=16, stride=1),  # identity shortcut
    ]
    # (mxu operand dtype, atol, rtol): f32 is the bit-conservative path; bf16
    # exercises the MXU-native path (f32 accumulation kept).
    dtypes = [(jnp.float32, 1e-2, 1e-2), (jnp.bfloat16, 5e-2, 5e-2)]

    for cfg in configs:
        kx, kp, key = jax.random.split(key, 3)
        x = jax.random.normal(
            kx, (cfg["B"], cfg["in_planes"], cfg["H"], cfg["W"]), jnp.float32)
        params = init_params(kp, cfg["in_planes"], cfg["planes"], cfg["stride"])
        y_ref = _reference(x, params, cfg["stride"])

        for mxu_dtype, atol, rtol in dtypes:
            y = preact_block_forward(x, params, stride=cfg["stride"],
                                     mxu_dtype=mxu_dtype)
            y = jax.block_until_ready(y)
            assert y.shape == y_ref.shape, (y.shape, y_ref.shape)
            max_err = float(jnp.max(jnp.abs(y - y_ref)))
            assert jnp.allclose(y, y_ref, atol=atol, rtol=rtol), \
                (cfg, str(mxu_dtype), max_err)

    print("KERNEL_OK")
</pallas_src>

<mosaic_0001>
module attributes {stable_mosaic.version = 11 : i64} {
  func.func @kernel(%arg0: i32, %arg1: memref<1x4x8x32xf32, #tpu.memory_space<vmem>>, %arg2: memref<1x32xf32, #tpu.memory_space<vmem>>, %arg3: memref<1x32xf32, #tpu.memory_space<vmem>>, %arg4: memref<192x64xf32, #tpu.memory_space<vmem>>, %arg5: memref<1x64xf32, #tpu.memory_space<vmem>>, %arg6: memref<1x64xf32, #tpu.memory_space<vmem>>, %arg7: memref<224x64xf32, #tpu.memory_space<vmem>>, %arg8: memref<1x8x64xf32, #tpu.memory_space<vmem>>) attributes {dimension_semantics = [#tpu.dimension_semantics<parallel>], iteration_bounds = array<i64: 2>, scalar_prefetch = 0 : i64, scratch_operands = 0 : i64, tpu.core_type = #tpu.core_type<tc>, window_params = [{transform_indices = @transform_0, window_bounds = array<i64: 1, 4, 8, 32>}, {pipeline_mode = #tpu.pipeline_mode<synchronous>, transform_indices = @transform_1, window_bounds = array<i64: 1, 32>}, {pipeline_mode = #tpu.pipeline_mode<synchronous>, transform_indices = @transform_2, window_bounds = array<i64: 1, 32>}, {pipeline_mode = #tpu.pipeline_mode<synchronous>, transform_indices = @transform_3, window_bounds = array<i64: 192, 64>}, {pipeline_mode = #tpu.pipeline_mode<synchronous>, transform_indices = @transform_4, window_bounds = array<i64: 1, 64>}, {pipeline_mode = #tpu.pipeline_mode<synchronous>, transform_indices = @transform_5, window_bounds = array<i64: 1, 64>}, {pipeline_mode = #tpu.pipeline_mode<synchronous>, transform_indices = @transform_6, window_bounds = array<i64: 224, 64>}, {transform_indices = @transform_7, window_bounds = array<i64: 1, 8, 64>}]} {
    %c0 = arith.constant 0 : index
    %c0_0 = arith.constant 0 : index
    %c0_1 = arith.constant 0 : index
    %c0_2 = arith.constant 0 : index
    %0 = vector.load %arg1[%c0, %c0_0, %c0_1, %c0_2] : memref<1x4x8x32xf32, #tpu.memory_space<vmem>>, vector<1x4x8x32xf32>
    %c0_3 = arith.constant 0 : index
    %c0_4 = arith.constant 0 : index
    %1 = vector.load %arg2[%c0_3, %c0_4] : memref<1x32xf32, #tpu.memory_space<vmem>>, vector<1x32xf32>
    %c0_5 = arith.constant 0 : index
    %c0_6 = arith.constant 0 : index
    %2 = vector.load %arg3[%c0_5, %c0_6] : memref<1x32xf32, #tpu.memory_space<vmem>>, vector<1x32xf32>
    %3 = vector.extract_strided_slice %0 {offsets = [0, 0, 0, 0], sizes = [1, 1, 8, 32], strides = [1, 1, 1, 1]} : vector<1x4x8x32xf32> to vector<1x1x8x32xf32>
    %4 = vector.shape_cast %3 : vector<1x1x8x32xf32> to vector<1x8x32xf32>
    %5 = vector.shape_cast %1 : vector<1x32xf32> to vector<1x1x32xf32>
    %6 = vector.broadcast %5 : vector<1x1x32xf32> to vector<1x8x32xf32>
    %7 = arith.mulf %4, %6 : vector<1x8x32xf32>
    %8 = vector.shape_cast %2 : vector<1x32xf32> to vector<1x1x32xf32>
    %9 = vector.broadcast %8 : vector<1x1x32xf32> to vector<1x8x32xf32>
    %10 = arith.addf %7, %9 : vector<1x8x32xf32>
    %cst = arith.constant 0.000000e+00 : f32
    %11 = vector.broadcast %cst : f32 to vector<1x8x32xf32>
    %12 = arith.maximumf %10, %11 : vector<1x8x32xf32>
    %13 = vector.extract_strided_slice %0 {offsets = [0, 1, 0, 0], sizes = [1, 1, 8, 32], strides = [1, 1, 1, 1]} : vector<1x4x8x32xf32> to vector<1x1x8x32xf32>
    %14 = vector.shape_cast %13 : vector<1x1x8x32xf32> to vector<1x8x32xf32>
    %15 = vector.shape_cast %1 : vector<1x32xf32> to vector<1x1x32xf32>
    %16 = vector.broadcast %15 : vector<1x1x32xf32> to vector<1x8x32xf32>
    %17 = arith.mulf %14, %16 : vector<1x8x32xf32>
    %18 = vector.shape_cast %2 : vector<1x32xf32> to vector<1x1x32xf32>
    %19 = vector.broadcast %18 : vector<1x1x32xf32> to vector<1x8x32xf32>
    %20 = arith.addf %17, %19 : vector<1x8x32xf32>
    %cst_7 = arith.constant 0.000000e+00 : f32
    %21 = vector.broadcast %cst_7 : f32 to vector<1x8x32xf32>
    %22 = arith.maximumf %20, %21 : vector<1x8x32xf32>
    %23 = vector.extract_strided_slice %0 {offsets = [0, 2, 0, 0], sizes = [1, 1, 8, 32], strides = [1, 1, 1, 1]} : vector<1x4x8x32xf32> to vector<1x1x8x32xf32>
    %24 = vector.shape_cast %23 : vector<1x1x8x32xf32> to vector<1x8x32xf32>
    %25 = vector.shape_cast %1 : vector<1x32xf32> to vector<1x1x32xf32>
    %26 = vector.broadcast %25 : vector<1x1x32xf32> to vector<1x8x32xf32>
    %27 = arith.mulf %24, %26 : vector<1x8x32xf32>
    %28 = vector.shape_cast %2 : vector<1x32xf32> to vector<1x1x32xf32>
    %29 = vector.broadcast %28 : vector<1x1x32xf32> to vector<1x8x32xf32>
    %30 = arith.addf %27, %29 : vector<1x8x32xf32>
    %cst_8 = arith.constant 0.000000e+00 : f32
    %31 = vector.broadcast %cst_8 : f32 to vector<1x8x32xf32>
    %32 = arith.maximumf %30, %31 : vector<1x8x32xf32>
    %33 = vector.extract_strided_slice %0 {offsets = [0, 3, 0, 0], sizes = [1, 1, 8, 32], strides = [1, 1, 1, 1]} : vector<1x4x8x32xf32> to vector<1x1x8x32xf32>
    %34 = vector.shape_cast %33 : vector<1x1x8x32xf32> to vector<1x8x32xf32>
    %35 = vector.shape_cast %1 : vector<1x32xf32> to vector<1x1x32xf32>
    %36 = vector.broadcast %35 : vector<1x1x32xf32> to vector<1x8x32xf32>
    %37 = arith.mulf %34, %36 : vector<1x8x32xf32>
    %38 = vector.shape_cast %2 : vector<1x32xf32> to vector<1x1x32xf32>
    %39 = vector.broadcast %38 : vector<1x1x32xf32> to vector<1x8x32xf32>
    %40 = arith.addf %37, %39 : vector<1x8x32xf32>
    %cst_9 = arith.constant 0.000000e+00 : f32
    %41 = vector.broadcast %cst_9 : f32 to vector<1x8x32xf32>
    %42 = arith.maximumf %40, %41 : vector<1x8x32xf32>
    %cst_10 = arith.constant 0.000000e+00 : f32
    %43 = vector.broadcast %cst_10 : f32 to vector<1x1x32xf32>
    %44 = vector.extract_strided_slice %32 {offsets = [0, 0, 0], sizes = [1, 7, 32], strides = [1, 1, 1]} : vector<1x8x32xf32> to vector<1x7x32xf32>
    %45 = tpu.concatenate %43, %44 in 1 : vector<1x1x32xf32>, vector<1x7x32xf32> -> vector<1x8x32xf32>
    %cst_11 = arith.constant 0.000000e+00 : f32
    %46 = vector.broadcast %cst_11 : f32 to vector<1x1x32xf32>
    %47 = vector.extract_strided_slice %42 {offsets = [0, 0, 0], sizes = [1, 7, 32], strides = [1, 1, 1]} : vector<1x8x32xf32> to vector<1x7x32xf32>
    %48 = tpu.concatenate %46, %47 in 1 : vector<1x1x32xf32>, vector<1x7x32xf32> -> vector<1x8x32xf32>
    %49 = tpu.concatenate %45, %48, %12, %22, %32, %42 in 2 : vector<1x8x32xf32>, vector<1x8x32xf32>, vector<1x8x32xf32>, vector<1x8x32xf32>, vector<1x8x32xf32>, vector<1x8x32xf32> -> vector<1x8x192xf32>
    %50 = vector.shape_cast %49 : vector<1x8x192xf32> to vector<8x192xf32>
    %c0_12 = arith.constant 0 : index
    %c0_13 = arith.constant 0 : index
    %51 = vector.load %arg4[%c0_12, %c0_13] : memref<192x64xf32, #tpu.memory_space<vmem>>, vector<192x64xf32>
    %cst_14 = arith.constant dense<0.000000e+00> : vector<8x64xf32>
    %52 = tpu.matmul %50, %51, %cst_14 {dimension_numbers = #tpu.dot_dimension_numbers<[1], [0], [0], [1], [0, 0, 1, 1], [], []>} : vector<8x192xf32>, vector<192x64xf32>, vector<8x64xf32> -> vector<8x64xf32>
    %c0_15 = arith.constant 0 : index
    %c0_16 = arith.constant 0 : index
    %53 = vector.load %arg5[%c0_15, %c0_16] : memref<1x64xf32, #tpu.memory_space<vmem>>, vector<1x64xf32>
    %54 = vector.broadcast %53 : vector<1x64xf32> to vector<8x64xf32>
    %55 = arith.mulf %52, %54 : vector<8x64xf32>
    %c0_17 = arith.constant 0 : index
    %c0_18 = arith.constant 0 : index
    %56 = vector.load %arg6[%c0_17, %c0_18] : memref<1x64xf32, #tpu.memory_space<vmem>>, vector<1x64xf32>
    %57 = vector.broadcast %56 : vector<1x64xf32> to vector<8x64xf32>
    %58 = arith.addf %55, %57 : vector<8x64xf32>
    %cst_19 = arith.constant 0.000000e+00 : f32
    %59 = vector.broadcast %cst_19 : f32 to vector<8x64xf32>
    %60 = arith.maximumf %58, %59 : vector<8x64xf32>
    %61 = vector.shape_cast %60 : vector<8x64xf32> to vector<1x8x64xf32>
    %cst_20 = arith.constant 0.000000e+00 : f32
    %62 = vector.broadcast %cst_20 : f32 to vector<1x1x64xf32>
    %63 = vector.extract_strided_slice %61 {offsets = [0, 0, 0], sizes = [1, 7, 64], strides = [1, 1, 1]} : vector<1x8x64xf32> to vector<1x7x64xf32>
    %64 = tpu.concatenate %62, %63 in 1 : vector<1x1x64xf32>, vector<1x7x64xf32> -> vector<1x8x64xf32>
    %cst_21 = arith.constant 0.000000e+00 : f32
    %65 = vector.broadcast %cst_21 : f32 to vector<1x1x64xf32>
    %66 = vector.extract_strided_slice %61 {offsets = [0, 1, 0], sizes = [1, 7, 64], strides = [1, 1, 1]} : vector<1x8x64xf32> to vector<1x7x64xf32>
    %67 = tpu.concatenate %66, %65 in 1 : vector<1x7x64xf32>, vector<1x1x64xf32> -> vector<1x8x64xf32>
    %68 = tpu.concatenate %64, %61, %67, %12 in 2 : vector<1x8x64xf32>, vector<1x8x64xf32>, vector<1x8x64xf32>, vector<1x8x32xf32> -> vector<1x8x224xf32>
    %69 = vector.shape_cast %68 : vector<1x8x224xf32> to vector<8x224xf32>
    %c0_22 = arith.constant 0 : index
    %c0_23 = arith.constant 0 : index
    %70 = vector.load %arg7[%c0_22, %c0_23] : memref<224x64xf32, #tpu.memory_space<vmem>>, vector<224x64xf32>
    %cst_24 = arith.constant dense<0.000000e+00> : vector<8x64xf32>
    %71 = tpu.matmul %69, %70, %cst_24 {dimension_numbers = #tpu.dot_dimension_numbers<[1], [0], [0], [1], [0, 0, 1, 1], [], []>} : vector<8x224xf32>, vector<224x64xf32>, vector<8x64xf32> -> vector<8x64xf32>
    %72 = vector.shape_cast %71 : vector<8x64xf32> to vector<1x8x64xf32>
    %c0_25 = arith.constant 0 : index
    %c0_26 = arith.constant 0 : index
    %c0_27 = arith.constant 0 : index
    %73 = vector.load %arg8[%c0_25, %c0_26, %c0_27] : memref<1x8x64xf32, #tpu.memory_space<vmem>>, vector<1x8x64xf32>
    tpu.vector_store %arg8[%c0_25, %c0_26, %c0_27], %72 {strides = array<i32>} : memref<1x8x64xf32, #tpu.memory_space<vmem>>, vector<1x8x64xf32>,
    return
  }
  func.func @transform_0(%arg0: i32) -> (i32, i32, i32, i32) {
    %c0_i32 = arith.constant 0 : i32
    %c0_i32_0 = arith.constant 0 : i32
    %c0_i32_1 = arith.constant 0 : i32
    %c0_i32_2 = arith.constant 0 : i32
    return %arg0, %c0_i32, %c0_i32_0, %c0_i32_1 : i32, i32, i32, i32
  }
  func.func @transform_1(%arg0: i32) -> (i32, i32) {
    %c0_i32 = arith.constant 0 : i32
    %c0_i32_0 = arith.constant 0 : i32
    %c0_i32_1 = arith.constant 0 : i32
    return %c0_i32, %c0_i32_0 : i32, i32
  }
  func.func @transform_2(%arg0: i32) -> (i32, i32) {
    %c0_i32 = arith.constant 0 : i32
    %c0_i32_0 = arith.constant 0 : i32
    %c0_i32_1 = arith.constant 0 : i32
    return %c0_i32, %c0_i32_0 : i32, i32
  }
  func.func @transform_3(%arg0: i32) -> (i32, i32) {
    %c0_i32 = arith.constant 0 : i32
    %c0_i32_0 = arith.constant 0 : i32
    %c0_i32_1 = arith.constant 0 : i32
    return %c0_i32, %c0_i32_0 : i32, i32
  }
  func.func @transform_4(%arg0: i32) -> (i32, i32) {
    %c0_i32 = arith.constant 0 : i32
    %c0_i32_0 = arith.constant 0 : i32
    %c0_i32_1 = arith.constant 0 : i32
    return %c0_i32, %c0_i32_0 : i32, i32
  }
  func.func @transform_5(%arg0: i32) -> (i32, i32) {
    %c0_i32 = arith.constant 0 : i32
    %c0_i32_0 = arith.constant 0 : i32
    %c0_i32_1 = arith.constant 0 : i32
    return %c0_i32, %c0_i32_0 : i32, i32
  }
  func.func @transform_6(%arg0: i32) -> (i32, i32) {
    %c0_i32 = arith.constant 0 : i32
    %c0_i32_0 = arith.constant 0 : i32
    %c0_i32_1 = arith.constant 0 : i32
    return %c0_i32, %c0_i32_0 : i32, i32
  }
  func.func @transform_7(%arg0: i32) -> (i32, i32, i32) {
    %c0_i32 = arith.constant 0 : i32
    %c0_i32_0 = arith.constant 0 : i32
    %c0_i32_1 = arith.constant 0 : i32
    return %arg0, %c0_i32, %c0_i32_0 : i32, i32, i32
  }
}

</mosaic_0001>

<bundles_post_ra>
// kernel: tpu_custom_call.1
= control target key start
LH: loop header
LB: loop body
LE: loop exit
PB: predicated region body
PF: predicated region fallthrough
CT: control target
= control target key end

     0   :  { %12 = vsyncpa [#allocation3], 0  ;;  %s1198_s0 = inlined_call_operand.vmem [shape: f32[2,4,8,32], index: 0, kind: input, shape index: {}]   ;;  %s1199_s1 = inlined_call_operand.vmem [shape: f32[1,32], index: 1, kind: input, shape index: {}]   ;;  %s1200_s2 = inlined_call_operand.vmem [shape: f32[1,32], index: 2, kind: input, shape index: {}]   ;;  %s1201_s3 = inlined_call_operand.vmem [shape: f32[192,64], index: 3, kind: input, shape index: {}]   ;;  %s1202_s4 = inlined_call_operand.vmem [shape: f32[1,64], index: 4, kind: input, shape index: {}]   ;;  %s1203_s5 = inlined_call_operand.vmem [shape: f32[1,64], index: 5, kind: input, shape index: {}]   ;;  %s1204_s6 = inlined_call_operand.vmem [shape: f32[224,64], index: 6, kind: input, shape index: {}]   ;;  %s1205_s7 = inlined_call_operand.hbm [shape: f32[2,8,64], index: 7, kind: output, shape index: {}]  }
   0x1   :  { %14 = vsyncpa [#allocation3 + $0x1], 0  ;;  %s888_s24 = smov 0   ;;  %s890_s25 = smov 0  }
   0x2   :  { %s892_s26 = smov 0   ;;  %s894_s27 = smov 0  }
   0x3 LB: > { %s909_s28 = sadd.s32 4294967295, %s841_s27   ;;  %s640_s29 = sadd.s32 4294967294, %s841_s27   ;;  %s841_s27 = sphi %s894_s27, %s1211_s27   ;;  %s837_s26 = sphi %s892_s26, %s1210_s26   ;;  %s833_s25 = sphi %s890_s25, %s1209_s25   ;;  %s829_s24 = sphi %s888_s24, %s1208_s24  }
   0x4   : > { %s913_s30 = sadd.s32 1, %s841_s27   ;;  %s179_s8 = sadd.s32 1, %s837_s26 }
   0x5   : > { %s176_s9 = ssub.s32 %s841_s27, %s913_s30  ;;  %p189_p0 = scmp.ne.s32.totalorder %s837_s26, %s833_s25 }
   0x6   : > { %p177_p1 = scmp.eq.s32.totalorder %s176_s9, 0  ;;  %p190_p2 = scmp.eq.s32.totalorder %s909_s28, 1 }
   0x7   : > { %p195_p3 = scmp.ne.s32.totalorder %s833_s25, %s829_s24  ;;  %p196_p4 = scmp.eq.s32.totalorder %s640_s29, 1 }
   0x8   : > { %s924_s10 = scalar_select %p177_p1, %s837_s26, %s179_s8  }
   0x9   : > { %p926_p5 = por %p190_p2, %p189_p0  ;;  %p930_p6 = por %p196_p4, %p195_p3 }
   0xa   : > { %p643_p7 = scmp.ge.s32.totalorder %s841_s27, 1  ;;  %p240_p8 = scmp.lt.s32.totalorder %s841_s27, 3 }
   0xc   : > { %p241_p9 = pnand %p643_p7, %p240_p8 }
   0xd   : > { %p272_p10 = scmp.lt.s32.totalorder (!%p241_p9), %s909_s28, 1  ;;  %v338_v0 = vld [vmem:[%s1201_s3] sm:$0xff] (!%p241_p9)  ;;  %v339_v1 = vld [vmem:[%s1201_s3 + $0x8] sm:$0xff] (!%p241_p9)  ;;  %v340_v2 = vld [vmem:[%s1201_s3 + $0x10] sm:$0xff] (!%p241_p9)  ;;  %v843_v3 = vmov (!%p241_p9), 0.0|0.0   ;;  %vm310_vm0 = vcmask (!%p241_p9), 1040384  }
   0xe   : > { %244 = sbr.rel (%p241_p9) target bundleno = 716 (0x2cc), region = 48  ;;  %658 = vmatprep.subr.bf16.mxu0 (!%p241_p9), %v843_v3  ;;  %v659_v4 = vpack.c.bf16 (!%p241_p9), %v339_v1, %v338_v0  ;;  %v341_v5 = vld [vmem:[%s1201_s3 + $0x18] sm:$0xff] (!%p241_p9)  ;;  %694 = vmatprep.subr.bf16.mxu1 (!%p241_p9), %v843_v3  ;;  %v647_v6 = vld [vmem:[%s1199_s1] ss:$0 sm:$0xff] (!%p241_p9)  ;;  %v343_v10 = vld [vmem:[%s1201_s3 + $0x28] sm:$0xff] (!%p241_p9)  ;;  %s844_s29 = smov (!%p241_p9), 32  }
   0xf   : > { %v662_v7 = vpack.c.bf16 (!%p241_p9), %v341_v5, %v340_v2  ;;  %v648_v8 = vld [vmem:[%s1200_s2] ss:$0 sm:$0xff] (!%p241_p9)  ;;  %v344_v20 = vld [vmem:[%s1201_s3 + $0x30] sm:$0xff] (!%p241_p9)  ;;  %v345_v21 = vld [vmem:[%s1201_s3 + $0x38] sm:$0xff] (!%p241_p9)  ;;  %s846_s20 = smov (!%p241_p9), 64   ;;  %vm331_vm1 = vcmask (!%p241_p9), 261120  }
  0x10   : > { %660 = vmatpush1.bf16.msra.mxu0 (!%p241_p9), %v659_v4  ;;  %v342_v9 = vld [vmem:[%s1201_s3 + $0x20] sm:$0xff] (!%p241_p9)  ;;  %v668_v26 = vpack.c.bf16 (!%p241_p9), %v345_v21, %v344_v20  ;;  %v347_v31 = vld [vmem:[%s1201_s3 + $0x48] sm:$0xff] (!%p241_p9)  ;;  %v348_v35 = vld [vmem:[%s1201_s3 + $0x50] sm:$0xff] (!%p241_p9)  ;;  %vm333_vm2 = vcmask (!%p241_p9), 523264   ;;  %vm335_vm3 = vcmask (!%p241_p9), 785408   ;;  %vm458_vm4 = vcmask (!%p241_p9), 1046528  }
  0x11   : > { %661 = vmatprep.subr.bf16.mxu0 (!%p241_p9), %v843_v3  ;;  %v665_v17 = vpack.c.bf16 (!%p241_p9), %v343_v10, %v342_v9  ;;  %v346_v30 = vld [vmem:[%s1201_s3 + $0x40] sm:$0xff] (!%p241_p9)  ;;  %v349_v36 = vld [vmem:[%s1201_s3 + $0x58] sm:$0xff] (!%p241_p9)  ;;  %v351_v39 = vld [vmem:[%s1201_s3 + $0x68] sm:$0xff] (!%p241_p9)  ;;  %s269_s14 = sand.u32 (!%p241_p9), 1, %s833_s25  }
  0x12   : > { %v671_v34 = vpack.c.bf16 (!%p241_p9), %v347_v31, %v346_v30  ;;  %v674_v37 = vpack.c.bf16 (!%p241_p9), %v349_v36, %v348_v35  ;;  %v350_v38 = vld [vmem:[%s1201_s3 + $0x60] sm:$0xff] (!%p241_p9)  ;;  %v352_v41 = vld [vmem:[%s1201_s3 + $0x70] sm:$0xff] (!%p241_p9)  ;;  %v353_v42 = vld [vmem:[%s1201_s3 + $0x78] sm:$0xff] (!%p241_p9)  ;;  %s644_s15 = sshll.u32 (!%p241_p9), %s269_s14, 3  ;;  %s568_s21 = scalar_lea.sflag (!%p241_p9), [#allocation3], %s269_s14 }
  0x13   : > { %v677_v40 = vpack.c.bf16 (!%p241_p9), %v351_v39, %v350_v38  ;;  %v680_v43 = vpack.c.bf16 (!%p241_p9), %v353_v42, %v352_v41  ;;  %v354_v44 = vld [vmem:[%s1201_s3 + $0x80] sm:$0xff] (!%p241_p9)  ;;  %v355_v45 = vld [vmem:[%s1201_s3 + $0x88] sm:$0xff] (!%p241_p9)  ;;  %v356_v47 = vld [vmem:[%s1201_s3 + $0x90] sm:$0xff] (!%p241_p9)  ;;  %s271_s16 = scalar_lea.vmem (!%p241_p9), [#allocation2], %s644_s15 }
  0x14   : > { %663 = vmatpush1.bf16.msra.mxu0 (!%p241_p9), %v662_v7  ;;  %v683_v46 = vpack.c.bf16 (!%p241_p9), %v355_v45, %v354_v44  ;;  %v357_v48 = vld [vmem:[%s1201_s3 + $0x98] sm:$0xff] (!%p241_p9)  ;;  %v358_v50 = vld [vmem:[%s1201_s3 + $0xa0] sm:$0xff] (!%p241_p9)  ;;  %v359_v51 = vld [vmem:[%s1201_s3 + $0xa8] sm:$0xff] (!%p241_p9) }
  0x15   : > { %s273_s19 = scalar_select %p272_p10, %s909_s28, 1  ;;  %664 = vmatprep.subr.bf16.mxu0 %v843_v3  ;;  %v686_v49 = vpack.c.bf16 %v357_v48, %v356_v47  ;;  %v689_v52 = vpack.c.bf16 %v359_v51, %v358_v50  ;;  %v360_v53 = vld [vmem:[%s1201_s3 + $0xb0] sm:$0xff]  ;;  %v361_v54 = vld [vmem:[%s1201_s3 + $0xb8] sm:$0xff]  ;;  %v465_v4 = vld [vmem:[%s1204_s6] sm:$0xff] }
  0x16   : > { %v692_v55 = vpack.c.bf16 %v361_v54, %v360_v53  ;;  %v466_v5 = vld [vmem:[%s1204_s6 + $0x8] sm:$0xff]  ;;  %v469_v10 = vld [vmem:[%s1204_s6 + $0x20] sm:$0xff]  ;;  %v476_v20 = vld [vmem:[%s1204_s6 + $0x58] sm:$0xff] }
  0x17   : > { %s657_s22 = sshll.u32 %s273_s19, 5  ;;  %v695_v7 = vpack.c.bf16 %v466_v5, %v465_v4  ;;  %v483_v31 = vld [vmem:[%s1204_s6 + $0x90] sm:$0xff]  ;;  %v486_v35 = vld [vmem:[%s1204_s6 + $0xa8] sm:$0xff]  ;;  %v488_v38 = vld [vmem:[%s1204_s6 + $0xb8] sm:$0xff] }
  0x18   : > { %s276_s13 = scalar_lea.vmem %s1198_s0, %s657_s22  ;;  %666 = vmatpush1.bf16.msra.mxu0 %v665_v17  ;;  %v474_v17 = vld [vmem:[%s1204_s6 + $0x48] sm:$0xff]  ;;  %v492_v44 = vld [vmem:[%s1204_s6 + $0xd8] sm:$0xff]  ;;  %v651_v48 = vld [vmem:[%s1203_s5] ss:$0 sm:$0xff] }
  0x19   : > { %v280_v11 = vld [vmem:[%s276_s13 + $0x18] sm:$0xff]  ;;  %v277_v12 = vld [vmem:[%s276_s13] sm:$0xff]  ;;  %v278_v13 = vld [vmem:[%s276_s13 + $0x8] sm:$0xff]  ;;  %667 = vmatprep.subr.bf16.mxu0 %v843_v3  ;;  %696 = vmatpush1.bf16.msra.mxu1 %v695_v7 }
  0x1a   : > { %v304_v14 = vmul.f32 %v647_v6, %v280_v11  ;;  %v298_v15 = vmul.f32 %v647_v6, %v278_v13  ;;  %v289_v16 = vmul.f32 %v647_v6, %v277_v12  ;;  %v279_v22 = vld [vmem:[%s276_s13 + $0x10] sm:$0xff]  ;;  %s845_s13 = smov 96   ;;  %697 = vmatprep.subr.bf16.mxu1 %v843_v3  ;;  %v470_v11 = vld [vmem:[%s1204_s6 + $0x28] sm:$0xff] }
  0x1b   : > { %v301_v23 = vmul.f32 %v647_v6, %v279_v22  ;;  %v467_v6 = vld [vmem:[%s1204_s6 + $0x10] sm:$0xff]  ;;  %v701_v12 = vpack.c.bf16 %v470_v11, %v469_v10  ;;  %v477_v22 = vld [vmem:[%s1204_s6 + $0x60] sm:$0xff]  ;;  %v490_v41 = vld [vmem:[%s1204_s6 + $0xc8] sm:$0xff] }
  0x1c   : > { %v305_v18 = vadd.f32 %v648_v8, %v304_v14  ;;  %v299_v19 = vadd.f32 %v648_v8, %v298_v15  ;;  %v296_v25 = vadd.f32 %v648_v8, %v289_v16  ;;  %669 = vmatpush1.bf16.msra.mxu0 %v668_v26  ;;  %v471_v13 = vld [vmem:[%s1204_s6 + $0x30] sm:$0xff]  ;;  %v472_v14 = vld [vmem:[%s1204_s6 + $0x38] sm:$0xff]  ;;  %v473_v16 = vld [vmem:[%s1204_s6 + $0x40] sm:$0xff] }
  0x1d   : > { %v302_v27 = vadd.f32 %v648_v8, %v301_v23  ;;  %670 = vmatprep.subr.bf16.mxu0 %v843_v3  ;;  %v468_v8 = vld [vmem:[%s1204_s6 + $0x18] sm:$0xff]  ;;  %v704_v15 = vpack.c.bf16 %v472_v14, %v471_v13  ;;  %v478_v23 = vld [vmem:[%s1204_s6 + $0x68] sm:$0xff] }
  0x1e   : > { %v306_v24 = vmax.f32 %v305_v18, 0.0  ;;  %v300_v29 = vmax.f32 %v299_v19, 0.0  ;;  %v297_v33 = vmax.f32 %v296_v25, 0.0  ;;  %v698_v9 = vpack.c.bf16 %v468_v8, %v467_v6  ;;  %v475_v19 = vld [vmem:[%s1204_s6 + $0x50] sm:$0xff]  ;;  %v480_v26 = vld [vmem:[%s1204_s6 + $0x78] sm:$0xff] }
  0x1f   : > { %v303_v56 = vmax.f32 %v302_v27, 0.0  ;;  %v707_v18 = vpack.c.bf16 %v474_v17, %v473_v16  ;;  %v710_v21 = vpack.c.bf16 %v476_v20, %v475_v19  ;;  %v479_v25 = vld [vmem:[%s1204_s6 + $0x70] sm:$0xff] }
  0x20   : > { %v313_v28 = vrot.slane %v306_v24, 7  ;;  %328 = vrot.lane.b32.xlu1 %v306_v24, %s844_s29  ;;  %672 = vmatpush1.bf16.msra.mxu0 %v671_v34  ;;  %v713_v24 = vpack.c.bf16 %v478_v23, %v477_v22  ;;  %v716_v27 = vpack.c.bf16 %v480_v26, %v479_v25  ;;  %v485_v34 = vld [vmem:[%s1204_s6 + $0xa0] sm:$0xff] }
  0x21   : > { %673 = vmatprep.subr.bf16.mxu0 %v843_v3  ;;  %v308_v57 = vrot.slane %v303_v56, 7  ;;  %699 = vmatpush1.bf16.msra.mxu1 %v698_v9  ;;  %v725_v36 = vpack.c.bf16 %v486_v35, %v485_v34 }
  0x22   : > { %v315_v32 = vsel %vm310_vm0, 0.0, %v313_v28  ;;  %700 = vmatprep.subr.bf16.mxu1 %v843_v3  ;;  %v481_v28 = vld [vmem:[%s1204_s6 + $0x80] sm:$0xff] }
  0x23   : > { %317 = vrot.lane.b32.xlu0 %v315_v32, %s844_s29  ;;  %v311_v61 = vsel %vm310_vm0, 0.0, %v308_v57  ;;  %v484_v32 = vld [vmem:[%s1204_s6 + $0x98] sm:$0xff] }
  0x24   : > { %325 = vrot.lane.b32.xlu1 %v300_v29, %s845_s13  ;;  %675 = vmatpush1.bf16.msra.mxu0 %v674_v37  ;;  %v482_v29 = vld [vmem:[%s1204_s6 + $0x88] sm:$0xff]  ;;  %v487_v37 = vld [vmem:[%s1204_s6 + $0xb0] sm:$0xff]  ;;  %s654_s13 = sshll.u32 %s909_s28, 7  ;;  %s847_s28 = smov [#allocation2]  }
  0x25   : > { %676 = vmatprep.subr.bf16.mxu0 %v843_v3  ;;  %702 = vmatpush1.bf16.msra.mxu1 %v701_v12  ;;  %v719_v30 = vpack.c.bf16 %v482_v29, %v481_v28  ;;  %v728_v39 = vpack.c.bf16 %v488_v38, %v487_v37  ;;  %s1155_s19 = scalar_lea.hbm %s1205_s7, %s654_s13  ;;  %s783_s23 = sshll.u32 %s847_s28, 4  ;;  %s784_s23 = int_to_ptr.vmem [resolvable:$false] %s783_s23 }
  0x26   : > { %703 = vmatprep.subr.bf16.mxu1 %v843_v3  ;;  %s785_s29 = scalar_lea.vmem %s784_s23, 256 }
  0x27   : > { %321 = vrot.lane.b32.xlu0 %v297_v33, %s846_s20  ;;  %v722_v33 = vpack.c.bf16 %v484_v32, %v483_v31 }
  0x28   : > { %678 = vmatpush1.bf16.msra.mxu0 %v677_v40  ;;  %v489_v40 = vld [vmem:[%s1204_s6 + $0xc0] sm:$0xff] }
  0x29   : > { %679 = vmatprep.subr.bf16.mxu0 %v843_v3  ;;  %705 = vmatpush1.bf16.msra.mxu1 %v704_v15  ;;  %v731_v42 = vpack.c.bf16 %v490_v41, %v489_v40 }
  0x2a   : > { %706 = vmatprep.subr.bf16.mxu1 %v843_v3 }
  0x2c   : > { %681 = vmatpush1.bf16.msra.mxu0 %v680_v43  ;;  %v491_v43 = vld [vmem:[%s1204_s6 + $0xd0] sm:$0xff] }
  0x2d   : > { %682 = vmatprep.subr.bf16.mxu0 %v843_v3  ;;  %708 = vmatpush1.bf16.msra.mxu1 %v707_v18  ;;  %v734_v45 = vpack.c.bf16 %v492_v44, %v491_v43 }
  0x2e   : > { %709 = vmatprep.subr.bf16.mxu1 %v843_v3 }
  0x30   : > { %684 = vmatpush1.bf16.msra.mxu0 %v683_v46  ;;  %v650_v46 = vld [vmem:[%s1202_s4] ss:$0 sm:$0xff] }
  0x31   : > { %685 = vmatprep.subr.bf16.mxu0 %v843_v3  ;;  %711 = vmatpush1.bf16.msra.mxu1 %v710_v21 }
  0x32   : > { %712 = vmatprep.subr.bf16.mxu1 %v843_v3 }
  0x34   : > { %687 = vmatpush1.bf16.msra.mxu0 %v686_v49 }
  0x35   : > { %688 = vmatprep.subr.bf16.mxu0 %v843_v3  ;;  %714 = vmatpush1.bf16.msra.mxu1 %v713_v24 }
  0x36   : > { %715 = vmatprep.subr.bf16.mxu1 %v843_v3 }
  0x38   : > { %690 = vmatpush1.bf16.msra.mxu0 %v689_v52 }
  0x39   : > { %691 = vmatprep.subr.bf16.mxu0 %v843_v3  ;;  %717 = vmatpush1.bf16.msra.mxu1 %v716_v27 }
  0x3a   : > { %718 = vmatprep.subr.bf16.mxu1 %v843_v3 }
  0x3c   : > { %693 = vmatpush1.bf16.msra.mxu0 %v692_v55 }
  0x3d   : > { %720 = vmatpush1.bf16.msra.mxu1 %v719_v30 }
  0x3e   : > { %721 = vmatprep.subr.bf16.mxu1 %v843_v3 }
  0x41   : > { %723 = vmatpush1.bf16.msra.mxu1 %v722_v33 }
  0x42   : > { %724 = vmatprep.subr.bf16.mxu1 %v843_v3 }
  0x45   : > { %726 = vmatpush1.bf16.msra.mxu1 %v725_v36 }
  0x46   : > { %727 = vmatprep.subr.bf16.mxu1 %v843_v3 }
  0x49   : > { %729 = vmatpush1.bf16.msra.mxu1 %v728_v39 }
  0x4a   : > { %730 = vmatprep.subr.bf16.mxu1 %v843_v3 }
  0x4d   : > { %732 = vmatpush1.bf16.msra.mxu1 %v731_v42 }
  0x4e   : > { %733 = vmatprep.subr.bf16.mxu1 %v843_v3 }
  0x51   : > { %735 = vmatpush1.bf16.msra.mxu1 %v734_v45 }
  0x92   : > { %v329_v58 = vpop.permute.xlu1 %328 }
  0x93   : > { %v337_v59 = vsel %vm331_vm1, %v303_v56, %v329_v58 }
  0x94   : > { %649 = vmatprep.mubr.msk.f32.mxu0 %vm333_vm2, %v337_v59 }
  0x95   : > { %v318_v60 = vpop.permute.xlu0 %317 }
  0x96   : > { %v326_v62 = vpop.permute.xlu1 %325  ;;  %v332_v63 = vsel %vm331_vm1, %v311_v61, %v318_v60 }
  0x99   : > { %v1036_v0 = vpop.permute.xlu0 %321 }
  0x9a   : > { %v334_v1 = vsel %vm333_vm2, %v332_v63, %v1036_v0 }
  0x9b   : > { %v336_v2 = vsel %vm335_vm3, %v334_v1, %v326_v62 }
  0x9c   : > { %430 = vmatmul.mubr.f32.vlgmr.msra.gmra.mrb[0].mxu0 %v336_v2 }
 0x16f   : > { %v431_v47 = vpop.f32.mrb[0].mxu0 }
 0x170   : > { %v442_v49 = vmul.f32 %v650_v46, %v431_v47  ;;  %v433_v50 = vpop.f32.mrb[1].mxu0 }
 0x172   : > { %v450_v51 = vadd.f32 %v651_v48, %v442_v49 }
 0x174   : > { %v451_v52 = vmax.f32 %v450_v51, 0.0 }
 0x176   : > { %460 = vrot.lane.b32.xlu0 %v451_v52, %s846_s20  ;;  %v456_v3 = vrot.slane %v451_v52, 1  ;;  %v453_v55 = vrot.slane %v451_v52, 7  ;;  %s581_s20 = sshll.u32 %s271_s16, 4  ;;  %s1157_s20 = int_to_ptr.vmem [resolvable:$true] %s581_s20 }
 0x177   : > { %s779_s22 = scalar_lea.vmem %s1157_s20, 128  ;;  %p786_p0 = scmp.lt.s32.totalorder %s1157_s20, %s784_s23 }
 0x178   : > { %v459_v53 = vsel %vm458_vm4, %v456_v3, 0.0  ;;  %v455_v57 = vsel %vm310_vm0, 0.0, %v453_v55  ;;  %p780_p11 = scmp.ne.s32.totalorder %s1157_s20, %s779_s22  ;;  %p787_p1 = scmp.lt.s32.totalorder %s785_s29, %s779_s22 }
 0x179   : > { %v464_v54 = vsel %vm333_vm2, %v459_v53, %v1036_v0 }
 0x17a   : > { %652 = vmatprep.mubr.msk.f32.mxu1 %vm335_vm3, %v464_v54  ;;  %p781_p12 = pnand %p780_p11, %p926_p5  ;;  %p788_p2 = por %p787_p1, %p786_p0 }
 0x17c   : > { %p782_p13 = pneg %p781_p12 }
 0x17e   : > { %p789_p3 = pnand %p788_p2, %p782_p13 }
 0x1e8   : > { %v461_v56 = vpop.permute.xlu0 %460 }
 0x1e9   : > { %v463_v58 = vsel %vm333_vm2, %v455_v57, %v461_v56 }
 0x1ea   : > { %561 = vmatmul.mubr.f32.vlgmr.msra.gmra.mrb[0].mxu1 %v463_v58 }
 0x2bd   : > { %v562_v59 = vpop.f32.mrb[0].mxu1 }
 0x2be   : > { %566 = vst.msk [vmem:[%s271_s16] sm:$0xff] %vm333_vm2, %v562_v59  ;;  %v564_v60 = vpop.f32.mrb[1].mxu1 }
 0x2bf   : > { %792 = shalt.err (!%p789_p3)
}
 0x2c0   : > { %s793_s8 = scalar_lea.hbm %s1155_s19, 128  ;;  %s797_s15 = scalar_lea.hbm %s1205_s7, 256 }
 0x2c1   : > { %p794_p4 = scmp.ne.s32.totalorder %s1155_s19, %s793_s8  ;;  %p798_p9 = scmp.lt.u32.totalorder %s1155_s19, %s1205_s7 }
 0x2c2   : > { %p799_p10 = scmp.lt.u32.totalorder %s797_s15, %s793_s8  ;;  %p801_p12 = scmp.lt.u32.totalorder %s793_s8, %s1155_s19 }
 0x2c3   : > { %p795_p7 = pnand %p794_p4, %p926_p5 }
 0x2c4   : > { %p800_p11 = por %p799_p10, %p798_p9 }
 0x2c5   : > { %p796_p8 = pneg %p795_p7 }
 0x2c6   : > { %p802_p13 = por %p801_p12, %p800_p11 }
 0x2c8   : > { %p803_p0 = pnand %p802_p13, %p796_p8 }
 0x2ca   : > { %806 = shalt.err (!%p803_p0)
}
 0x2cb   : > { %736 = dma.vmem_to_hbm [thread:$0]  (%p926_p5), %s1157_s20, 128, %s1155_s19, %s568_s21  }
 0x2cc PF: > { %p742_p1 = scmp.ge.s32.totalorder %s841_s27, 2  ;;  %s593_s17 = sand.u32 1, %s829_s24  }
 0x2cd   : > { %s594_s18 = scalar_lea.sflag [#allocation3], %s593_s17 }
 0x2ce   : > { %p739_p2 = pnand %p742_p1, %p930_p6 }
 0x2d0   : > { %824 = dma.done.wait (!%p739_p2), %s594_s18, 128  }
 0x2d1   : > { %826 = vsyncadd (!%p739_p2), %s594_s18, 4294967168  ;;  %p17_p3 = scmp.ge.s32.totalorder %s913_s30, 4   ;;  %s1208_s24 = smov %s833_s25 }
 0x2d2   : > { %s1209_s25 = smov %s837_s26  ;;  %s1210_s26 = smov %s924_s10 }
 0x2d3   : > { %s1211_s27 = smov %s913_s30  ;;  %19 = sbr.rel (!%p17_p3) target bundleno = 3 (0x3), region = 83 }
 0x2da   :  { %599 = vsyncpa [#allocation3], 1 }
 0x2db   :  { %601 = vsyncpa [#allocation3 + $0x1], 1 }

</bundles_post_ra>
